<compile_context>
chip_gen: v5e
topology: v5e:2x2
jax: 0.10.0
libtpu: 0.0.40
codegen_flags: <defaults>
</compile_context>

<pallas_src>
import functools

import jax
import jax.numpy as jnp
from jax.experimental import pallas as pl
from jax.experimental.pallas import tpu as pltpu

NEG_SLOPE = 0.01   # PyTorch nn.LeakyReLU default
LANE = 128         # TPU vreg lane width
SUBLANE = 8        # f32 sublane packing
W_SUBLANE = 16     # bf16 sublane packing (weight-row padding granularity)


def _round_up(x, m):
    return (x + m - 1) // m * m


def _ae_kernel(x_ref, *refs):
    """x_ref: (TB, NPAD_in) f32 activations.
    refs[:-1]: per-layer bf16 param slabs, each (kpad_i + 1, npad_i), weight in
               rows [0, kpad_i), bias in row kpad_i, all padding zero.
    refs[-1]: (TB, NPAD_out) f32 output."""
    p_refs, o_ref = refs[:-1], refs[-1]

    h = x_ref[...]                                        # f32, lane-dense
    for p_ref in p_refs:                                  # static unroll (8 layers)
        kpad = p_ref.shape[0] - 1                         # padded contraction dim
        w = p_ref[:kpad, :]                               # (kpad, npad) bf16
        b = p_ref[kpad:kpad + 1, :].astype(jnp.float32)   # (1, npad) bias

        # h's padded lanes beyond kpad are exact zeros, so the static lane
        # slice is numerically exact and trims MXU work per layer.
        hk = h if h.shape[1] == kpad else h[:, :kpad]
        h = jnp.dot(hk.astype(jnp.bfloat16), w,
                    preferred_element_type=jnp.float32)   # bf16 MXU, f32 acc
        h = h + b                                         # f32 bias add (VPU)
        h = jnp.where(h > 0, h, NEG_SLOPE * h)            # LeakyReLU in f32
    o_ref[...] = h.astype(o_ref.dtype)


def pack_params(params):
    """Pack [w1, b1, ..., wL, bL] into per-layer bf16 slabs (done ONCE at init).

    Layer i -> zero-padded array of shape (round_up(in_i,16) + 1, round_up(out_i,128)):
    rows [0, in_i) hold W (stored (in, out) so h @ W == x @ W_pt.T), last row holds b.
    """
    packed = []
    for i in range(len(params) // 2):
        w = jnp.asarray(params[2 * i], jnp.float32)        # (in_i, out_i)
        b = jnp.asarray(params[2 * i + 1], jnp.float32).reshape(-1)
        fin, fout = w.shape
        kpad = _round_up(fin, W_SUBLANE)
        npad = _round_up(fout, LANE)
        slab = jnp.zeros((kpad + 1, npad), jnp.float32)
        slab = slab.at[:fin, :fout].set(w)
        slab = slab.at[kpad, :fout].set(b)
        packed.append(slab.astype(jnp.bfloat16))
    return packed


def _pick_batch_tile(batch):
    if batch >= 512:
        return 256                                   # big tile: amortize step overhead
    if batch >= 256:
        return 128
    if batch >= 16:
        # Guarantee >= 2 grid steps so the "parallel" axis can use both v7x TCs.
        return _round_up((batch + 1) // 2, SUBLANE)
    return _round_up(max(batch, 1), SUBLANE)


@jax.jit
def autoencoder_forward(x, packed_params):
    """x: (batch, input_size) f32. packed_params: list of per-layer bf16 slabs."""
    batch, input_size = x.shape
    n_layers = len(packed_params)
    in_pad = _round_up(input_size, LANE)
    out_pad = packed_params[-1].shape[1]             # == round_up(input_size, 128)

    tb = _pick_batch_tile(batch)
    batch_pad = _round_up(batch, tb)
    grid = (batch_pad // tb,)

    x_pad = jnp.pad(x.astype(jnp.float32),
                    ((0, batch_pad - batch), (0, in_pad - input_size)))

    # VMEM budget: single resident copy of all params + double-buffered
    # activation tiles + headroom, clamped to physical device capacity.
    param_bytes = sum(int(p.size) * p.dtype.itemsize for p in packed_params)
    tile_bytes = tb * max(in_pad, out_pad) * 4
    needed = param_bytes + 4 * tile_bytes + (8 << 20)
    try:
        vmem_cap = int(pltpu.get_tpu_info().vmem_capacity_bytes)
    except Exception:
        vmem_cap = 64 << 20                          # v7x per-TC capacity (smallest)
    vmem_limit = int(min(max(needed, 32 << 20), int(vmem_cap * 0.9)))

    param_specs = [pl.BlockSpec(memory_space=pltpu.MemorySpace.VMEM)
                   for _ in range(n_layers)]         # whole array resident, no dbl-buf

    out_padded = pl.pallas_call(
        _ae_kernel,
        out_shape=jax.ShapeDtypeStruct((batch_pad, out_pad), jnp.float32),
        grid_spec=pltpu.PrefetchScalarGridSpec(
            num_scalar_prefetch=0,
            grid=grid,
            in_specs=[pl.BlockSpec((tb, in_pad), lambda i: (i, 0))] + param_specs,
            out_specs=pl.BlockSpec((tb, out_pad), lambda i: (i, 0)),
        ),
        compiler_params=pltpu.CompilerParams(
            dimension_semantics=("parallel",),       # shard batch tiles across TCs
            vmem_limit_bytes=vmem_limit,
        ),
    )(x_pad, *packed_params)

    return out_padded[:batch, :input_size]


def make_params(key, input_size, latent_dim=2):
    """Deterministic params with PyTorch-default-style uniform init (f32)."""
    dims = [
        input_size, input_size // 2, input_size // 4, input_size // 8,
        latent_dim,
        input_size // 8, input_size // 4, input_size // 2, input_size,
    ]
    params = []
    for i in range(len(dims) - 1):
        fan_in, fan_out = dims[i], dims[i + 1]
        key, kw, kb = jax.random.split(key, 3)
        bound = 1.0 / jnp.sqrt(jnp.float32(fan_in))
        w = jax.random.uniform(kw, (fan_in, fan_out), jnp.float32, -bound, bound)
        b = jax.random.uniform(kb, (1, fan_out), jnp.float32, -bound, bound)
        params += [w, b]
    return params


def _reference_forward(x, params):
    """Pure-JAX reference mirroring the kernel's bf16-weight / f32-accumulate
    numerics (weights, biases and pre-dot activations quantized to bf16)."""
    h = x.astype(jnp.float32)
    for i in range(len(params) // 2):
        w = params[2 * i].astype(jnp.bfloat16).astype(jnp.float32)
        b = params[2 * i + 1].astype(jnp.bfloat16).astype(jnp.float32).reshape(1, -1)
        hq = h.astype(jnp.bfloat16).astype(jnp.float32)
        h = jnp.dot(hq, w, precision=jax.lax.Precision.HIGHEST) + b
        h = jnp.where(h > 0, h, NEG_SLOPE * h)
    return h


if __name__ == "__main__":
    INPUT_SIZE = 64
    LATENT_DIM = 2
    BATCH = 8

    key = jax.random.PRNGKey(0)
    key, kx = jax.random.split(key)
    x = jax.random.normal(kx, (BATCH, INPUT_SIZE), jnp.float32)
    params = make_params(key, INPUT_SIZE, LATENT_DIM)
    packed = pack_params(params)          # packed once at init, reused every call

    out = jax.block_until_ready(autoencoder_forward(x, packed))
    ref = _reference_forward(x, params)

    assert out.shape == (BATCH, INPUT_SIZE), out.shape
    max_err = float(jnp.max(jnp.abs(out - ref)))
    assert jnp.allclose(out, ref, atol=1e-4, rtol=1e-4), f"mismatch, max_err={max_err}"
    print("KERNEL_OK")
</pallas_src>

<mosaic_0001>
module attributes {stable_mosaic.version = 11 : i64} {
  func.func @_ae_kernel(%arg0: i32, %arg1: memref<8x128xf32, #tpu.memory_space<vmem>>, %arg2: memref<65x128xbf16, #tpu.memory_space<vmem>>, %arg3: memref<33x128xbf16, #tpu.memory_space<vmem>>, %arg4: memref<17x128xbf16, #tpu.memory_space<vmem>>, %arg5: memref<17x128xbf16, #tpu.memory_space<vmem>>, %arg6: memref<17x128xbf16, #tpu.memory_space<vmem>>, %arg7: memref<17x128xbf16, #tpu.memory_space<vmem>>, %arg8: memref<17x128xbf16, #tpu.memory_space<vmem>>, %arg9: memref<33x128xbf16, #tpu.memory_space<vmem>>, %arg10: memref<8x128xf32, #tpu.memory_space<vmem>>) attributes {dimension_semantics = [#tpu.dimension_semantics<parallel>], iteration_bounds = array<i64: 1>, scalar_prefetch = 0 : i64, scratch_operands = 0 : i64, tpu.core_type = #tpu.core_type<tc>, window_params = [{transform_indices = @transform_0, window_bounds = array<i64: 8, 128>}, {pipeline_mode = #tpu.pipeline_mode<synchronous>, transform_indices = @transform_1, window_bounds = array<i64: 65, 128>}, {pipeline_mode = #tpu.pipeline_mode<synchronous>, transform_indices = @transform_2, window_bounds = array<i64: 33, 128>}, {pipeline_mode = #tpu.pipeline_mode<synchronous>, transform_indices = @transform_3, window_bounds = array<i64: 17, 128>}, {pipeline_mode = #tpu.pipeline_mode<synchronous>, transform_indices = @transform_4, window_bounds = array<i64: 17, 128>}, {pipeline_mode = #tpu.pipeline_mode<synchronous>, transform_indices = @transform_5, window_bounds = array<i64: 17, 128>}, {pipeline_mode = #tpu.pipeline_mode<synchronous>, transform_indices = @transform_6, window_bounds = array<i64: 17, 128>}, {pipeline_mode = #tpu.pipeline_mode<synchronous>, transform_indices = @transform_7, window_bounds = array<i64: 17, 128>}, {pipeline_mode = #tpu.pipeline_mode<synchronous>, transform_indices = @transform_8, window_bounds = array<i64: 33, 128>}, {transform_indices = @transform_9, window_bounds = array<i64: 8, 128>}]} {
    %c0 = arith.constant 0 : index
    %c0_0 = arith.constant 0 : index
    %0 = vector.load %arg1[%c0, %c0_0] : memref<8x128xf32, #tpu.memory_space<vmem>>, vector<8x128xf32>
    %c0_1 = arith.constant 0 : index
    %c0_2 = arith.constant 0 : index
    %1 = vector.load %arg2[%c0_1, %c0_2] : memref<65x128xbf16, #tpu.memory_space<vmem>>, vector<64x128xbf16>
    %c64 = arith.constant 64 : index
    %c0_3 = arith.constant 0 : index
    %2 = vector.load %arg2[%c64, %c0_3] : memref<65x128xbf16, #tpu.memory_space<vmem>>, vector<1x128xbf16>
    %3 = arith.extf %2 : vector<1x128xbf16> to vector<1x128xf32>
    %4 = vector.extract_strided_slice %0 {offsets = [0, 0], sizes = [8, 64], strides = [1, 1]} : vector<8x128xf32> to vector<8x64xf32>
    %5 = arith.truncf %4 : vector<8x64xf32> to vector<8x64xbf16>
    %cst = arith.constant dense<0.000000e+00> : vector<8x128xf32>
    %6 = tpu.matmul %5, %1, %cst {dimension_numbers = #tpu.dot_dimension_numbers<[1], [0], [0], [1], [0, 0, 1, 1], [], []>} : vector<8x64xbf16>, vector<64x128xbf16>, vector<8x128xf32> -> vector<8x128xf32>
    %7 = vector.broadcast %3 : vector<1x128xf32> to vector<8x128xf32>
    %8 = arith.addf %6, %7 : vector<8x128xf32>
    %cst_4 = arith.constant 0.000000e+00 : f32
    %9 = vector.broadcast %cst_4 : f32 to vector<8x128xf32>
    %10 = arith.cmpf ogt, %8, %9 : vector<8x128xf32>
    %cst_5 = arith.constant 0.00999999977 : f32
    %11 = vector.broadcast %cst_5 : f32 to vector<8x128xf32>
    %12 = arith.mulf %11, %8 : vector<8x128xf32>
    %13 = arith.select %10, %8, %12 : vector<8x128xi1>, vector<8x128xf32>
    %c0_6 = arith.constant 0 : index
    %c0_7 = arith.constant 0 : index
    %14 = vector.load %arg3[%c0_6, %c0_7] : memref<33x128xbf16, #tpu.memory_space<vmem>>, vector<32x128xbf16>
    %c32 = arith.constant 32 : index
    %c0_8 = arith.constant 0 : index
    %15 = vector.load %arg3[%c32, %c0_8] : memref<33x128xbf16, #tpu.memory_space<vmem>>, vector<1x128xbf16>
    %16 = arith.extf %15 : vector<1x128xbf16> to vector<1x128xf32>
    %17 = vector.extract_strided_slice %13 {offsets = [0, 0], sizes = [8, 32], strides = [1, 1]} : vector<8x128xf32> to vector<8x32xf32>
    %18 = arith.truncf %17 : vector<8x32xf32> to vector<8x32xbf16>
    %cst_9 = arith.constant dense<0.000000e+00> : vector<8x128xf32>
    %19 = tpu.matmul %18, %14, %cst_9 {dimension_numbers = #tpu.dot_dimension_numbers<[1], [0], [0], [1], [0, 0, 1, 1], [], []>} : vector<8x32xbf16>, vector<32x128xbf16>, vector<8x128xf32> -> vector<8x128xf32>
    %20 = vector.broadcast %16 : vector<1x128xf32> to vector<8x128xf32>
    %21 = arith.addf %19, %20 : vector<8x128xf32>
    %cst_10 = arith.constant 0.000000e+00 : f32
    %22 = vector.broadcast %cst_10 : f32 to vector<8x128xf32>
    %23 = arith.cmpf ogt, %21, %22 : vector<8x128xf32>
    %cst_11 = arith.constant 0.00999999977 : f32
    %24 = vector.broadcast %cst_11 : f32 to vector<8x128xf32>
    %25 = arith.mulf %24, %21 : vector<8x128xf32>
    %26 = arith.select %23, %21, %25 : vector<8x128xi1>, vector<8x128xf32>
    %c0_12 = arith.constant 0 : index
    %c0_13 = arith.constant 0 : index
    %27 = vector.load %arg4[%c0_12, %c0_13] : memref<17x128xbf16, #tpu.memory_space<vmem>>, vector<16x128xbf16>
    %c16 = arith.constant 16 : index
    %c0_14 = arith.constant 0 : index
    %28 = vector.load %arg4[%c16, %c0_14] : memref<17x128xbf16, #tpu.memory_space<vmem>>, vector<1x128xbf16>
    %29 = arith.extf %28 : vector<1x128xbf16> to vector<1x128xf32>
    %30 = vector.extract_strided_slice %26 {offsets = [0, 0], sizes = [8, 16], strides = [1, 1]} : vector<8x128xf32> to vector<8x16xf32>
    %31 = arith.truncf %30 : vector<8x16xf32> to vector<8x16xbf16>
    %cst_15 = arith.constant dense<0.000000e+00> : vector<8x128xf32>
    %32 = tpu.matmul %31, %27, %cst_15 {dimension_numbers = #tpu.dot_dimension_numbers<[1], [0], [0], [1], [0, 0, 1, 1], [], []>} : vector<8x16xbf16>, vector<16x128xbf16>, vector<8x128xf32> -> vector<8x128xf32>
    %33 = vector.broadcast %29 : vector<1x128xf32> to vector<8x128xf32>
    %34 = arith.addf %32, %33 : vector<8x128xf32>
    %cst_16 = arith.constant 0.000000e+00 : f32
    %35 = vector.broadcast %cst_16 : f32 to vector<8x128xf32>
    %36 = arith.cmpf ogt, %34, %35 : vector<8x128xf32>
    %cst_17 = arith.constant 0.00999999977 : f32
    %37 = vector.broadcast %cst_17 : f32 to vector<8x128xf32>
    %38 = arith.mulf %37, %34 : vector<8x128xf32>
    %39 = arith.select %36, %34, %38 : vector<8x128xi1>, vector<8x128xf32>
    %c0_18 = arith.constant 0 : index
    %c0_19 = arith.constant 0 : index
    %40 = vector.load %arg5[%c0_18, %c0_19] : memref<17x128xbf16, #tpu.memory_space<vmem>>, vector<16x128xbf16>
    %c16_20 = arith.constant 16 : index
    %c0_21 = arith.constant 0 : index
    %41 = vector.load %arg5[%c16_20, %c0_21] : memref<17x128xbf16, #tpu.memory_space<vmem>>, vector<1x128xbf16>
    %42 = arith.extf %41 : vector<1x128xbf16> to vector<1x128xf32>
    %43 = vector.extract_strided_slice %39 {offsets = [0, 0], sizes = [8, 16], strides = [1, 1]} : vector<8x128xf32> to vector<8x16xf32>
    %44 = arith.truncf %43 : vector<8x16xf32> to vector<8x16xbf16>
    %cst_22 = arith.constant dense<0.000000e+00> : vector<8x128xf32>
    %45 = tpu.matmul %44, %40, %cst_22 {dimension_numbers = #tpu.dot_dimension_numbers<[1], [0], [0], [1], [0, 0, 1, 1], [], []>} : vector<8x16xbf16>, vector<16x128xbf16>, vector<8x128xf32> -> vector<8x128xf32>
    %46 = vector.broadcast %42 : vector<1x128xf32> to vector<8x128xf32>
    %47 = arith.addf %45, %46 : vector<8x128xf32>
    %cst_23 = arith.constant 0.000000e+00 : f32
    %48 = vector.broadcast %cst_23 : f32 to vector<8x128xf32>
    %49 = arith.cmpf ogt, %47, %48 : vector<8x128xf32>
    %cst_24 = arith.constant 0.00999999977 : f32
    %50 = vector.broadcast %cst_24 : f32 to vector<8x128xf32>
    %51 = arith.mulf %50, %47 : vector<8x128xf32>
    %52 = arith.select %49, %47, %51 : vector<8x128xi1>, vector<8x128xf32>
    %c0_25 = arith.constant 0 : index
    %c0_26 = arith.constant 0 : index
    %53 = vector.load %arg6[%c0_25, %c0_26] : memref<17x128xbf16, #tpu.memory_space<vmem>>, vector<16x128xbf16>
    %c16_27 = arith.constant 16 : index
    %c0_28 = arith.constant 0 : index
    %54 = vector.load %arg6[%c16_27, %c0_28] : memref<17x128xbf16, #tpu.memory_space<vmem>>, vector<1x128xbf16>
    %55 = arith.extf %54 : vector<1x128xbf16> to vector<1x128xf32>
    %56 = vector.extract_strided_slice %52 {offsets = [0, 0], sizes = [8, 16], strides = [1, 1]} : vector<8x128xf32> to vector<8x16xf32>
    %57 = arith.truncf %56 : vector<8x16xf32> to vector<8x16xbf16>
    %cst_29 = arith.constant dense<0.000000e+00> : vector<8x128xf32>
    %58 = tpu.matmul %57, %53, %cst_29 {dimension_numbers = #tpu.dot_dimension_numbers<[1], [0], [0], [1], [0, 0, 1, 1], [], []>} : vector<8x16xbf16>, vector<16x128xbf16>, vector<8x128xf32> -> vector<8x128xf32>
    %59 = vector.broadcast %55 : vector<1x128xf32> to vector<8x128xf32>
    %60 = arith.addf %58, %59 : vector<8x128xf32>
    %cst_30 = arith.constant 0.000000e+00 : f32
    %61 = vector.broadcast %cst_30 : f32 to vector<8x128xf32>
    %62 = arith.cmpf ogt, %60, %61 : vector<8x128xf32>
    %cst_31 = arith.constant 0.00999999977 : f32
    %63 = vector.broadcast %cst_31 : f32 to vector<8x128xf32>
    %64 = arith.mulf %63, %60 : vector<8x128xf32>
    %65 = arith.select %62, %60, %64 : vector<8x128xi1>, vector<8x128xf32>
    %c0_32 = arith.constant 0 : index
    %c0_33 = arith.constant 0 : index
    %66 = vector.load %arg7[%c0_32, %c0_33] : memref<17x128xbf16, #tpu.memory_space<vmem>>, vector<16x128xbf16>
    %c16_34 = arith.constant 16 : index
    %c0_35 = arith.constant 0 : index
    %67 = vector.load %arg7[%c16_34, %c0_35] : memref<17x128xbf16, #tpu.memory_space<vmem>>, vector<1x128xbf16>
    %68 = arith.extf %67 : vector<1x128xbf16> to vector<1x128xf32>
    %69 = vector.extract_strided_slice %65 {offsets = [0, 0], sizes = [8, 16], strides = [1, 1]} : vector<8x128xf32> to vector<8x16xf32>
    %70 = arith.truncf %69 : vector<8x16xf32> to vector<8x16xbf16>
    %cst_36 = arith.constant dense<0.000000e+00> : vector<8x128xf32>
    %71 = tpu.matmul %70, %66, %cst_36 {dimension_numbers = #tpu.dot_dimension_numbers<[1], [0], [0], [1], [0, 0, 1, 1], [], []>} : vector<8x16xbf16>, vector<16x128xbf16>, vector<8x128xf32> -> vector<8x128xf32>
    %72 = vector.broadcast %68 : vector<1x128xf32> to vector<8x128xf32>
    %73 = arith.addf %71, %72 : vector<8x128xf32>
    %cst_37 = arith.constant 0.000000e+00 : f32
    %74 = vector.broadcast %cst_37 : f32 to vector<8x128xf32>
    %75 = arith.cmpf ogt, %73, %74 : vector<8x128xf32>
    %cst_38 = arith.constant 0.00999999977 : f32
    %76 = vector.broadcast %cst_38 : f32 to vector<8x128xf32>
    %77 = arith.mulf %76, %73 : vector<8x128xf32>
    %78 = arith.select %75, %73, %77 : vector<8x128xi1>, vector<8x128xf32>
    %c0_39 = arith.constant 0 : index
    %c0_40 = arith.constant 0 : index
    %79 = vector.load %arg8[%c0_39, %c0_40] : memref<17x128xbf16, #tpu.memory_space<vmem>>, vector<16x128xbf16>
    %c16_41 = arith.constant 16 : index
    %c0_42 = arith.constant 0 : index
    %80 = vector.load %arg8[%c16_41, %c0_42] : memref<17x128xbf16, #tpu.memory_space<vmem>>, vector<1x128xbf16>
    %81 = arith.extf %80 : vector<1x128xbf16> to vector<1x128xf32>
    %82 = vector.extract_strided_slice %78 {offsets = [0, 0], sizes = [8, 16], strides = [1, 1]} : vector<8x128xf32> to vector<8x16xf32>
    %83 = arith.truncf %82 : vector<8x16xf32> to vector<8x16xbf16>
    %cst_43 = arith.constant dense<0.000000e+00> : vector<8x128xf32>
    %84 = tpu.matmul %83, %79, %cst_43 {dimension_numbers = #tpu.dot_dimension_numbers<[1], [0], [0], [1], [0, 0, 1, 1], [], []>} : vector<8x16xbf16>, vector<16x128xbf16>, vector<8x128xf32> -> vector<8x128xf32>
    %85 = vector.broadcast %81 : vector<1x128xf32> to vector<8x128xf32>
    %86 = arith.addf %84, %85 : vector<8x128xf32>
    %cst_44 = arith.constant 0.000000e+00 : f32
    %87 = vector.broadcast %cst_44 : f32 to vector<8x128xf32>
    %88 = arith.cmpf ogt, %86, %87 : vector<8x128xf32>
    %cst_45 = arith.constant 0.00999999977 : f32
    %89 = vector.broadcast %cst_45 : f32 to vector<8x128xf32>
    %90 = arith.mulf %89, %86 : vector<8x128xf32>
    %91 = arith.select %88, %86, %90 : vector<8x128xi1>, vector<8x128xf32>
    %c0_46 = arith.constant 0 : index
    %c0_47 = arith.constant 0 : index
    %92 = vector.load %arg9[%c0_46, %c0_47] : memref<33x128xbf16, #tpu.memory_space<vmem>>, vector<32x128xbf16>
    %c32_48 = arith.constant 32 : index
    %c0_49 = arith.constant 0 : index
    %93 = vector.load %arg9[%c32_48, %c0_49] : memref<33x128xbf16, #tpu.memory_space<vmem>>, vector<1x128xbf16>
    %94 = arith.extf %93 : vector<1x128xbf16> to vector<1x128xf32>
    %95 = vector.extract_strided_slice %91 {offsets = [0, 0], sizes = [8, 32], strides = [1, 1]} : vector<8x128xf32> to vector<8x32xf32>
    %96 = arith.truncf %95 : vector<8x32xf32> to vector<8x32xbf16>
    %cst_50 = arith.constant dense<0.000000e+00> : vector<8x128xf32>
    %97 = tpu.matmul %96, %92, %cst_50 {dimension_numbers = #tpu.dot_dimension_numbers<[1], [0], [0], [1], [0, 0, 1, 1], [], []>} : vector<8x32xbf16>, vector<32x128xbf16>, vector<8x128xf32> -> vector<8x128xf32>
    %98 = vector.broadcast %94 : vector<1x128xf32> to vector<8x128xf32>
    %99 = arith.addf %97, %98 : vector<8x128xf32>
    %cst_51 = arith.constant 0.000000e+00 : f32
    %100 = vector.broadcast %cst_51 : f32 to vector<8x128xf32>
    %101 = arith.cmpf ogt, %99, %100 : vector<8x128xf32>
    %cst_52 = arith.constant 0.00999999977 : f32
    %102 = vector.broadcast %cst_52 : f32 to vector<8x128xf32>
    %103 = arith.mulf %102, %99 : vector<8x128xf32>
    %104 = arith.select %101, %99, %103 : vector<8x128xi1>, vector<8x128xf32>
    %c0_53 = arith.constant 0 : index
    %c0_54 = arith.constant 0 : index
    %105 = vector.load %arg10[%c0_53, %c0_54] : memref<8x128xf32, #tpu.memory_space<vmem>>, vector<8x128xf32>
    tpu.vector_store %arg10[%c0_53, %c0_54], %104 {strides = array<i32>} : memref<8x128xf32, #tpu.memory_space<vmem>>, vector<8x128xf32>,
    return
  }
  func.func @transform_0(%arg0: i32) -> (i32, i32) {
    %c0_i32 = arith.constant 0 : i32
    %c0_i32_0 = arith.constant 0 : i32
    return %arg0, %c0_i32 : i32, i32
  }
  func.func @transform_1(%arg0: i32) -> (i32, i32) {
    %c0_i32 = arith.constant 0 : i32
    %c0_i32_0 = arith.constant 0 : i32
    %c0_i32_1 = arith.constant 0 : i32
    return %c0_i32, %c0_i32_0 : i32, i32
  }
  func.func @transform_2(%arg0: i32) -> (i32, i32) {
    %c0_i32 = arith.constant 0 : i32
    %c0_i32_0 = arith.constant 0 : i32
    %c0_i32_1 = arith.constant 0 : i32
    return %c0_i32, %c0_i32_0 : i32, i32
  }
  func.func @transform_3(%arg0: i32) -> (i32, i32) {
    %c0_i32 = arith.constant 0 : i32
    %c0_i32_0 = arith.constant 0 : i32
    %c0_i32_1 = arith.constant 0 : i32
    return %c0_i32, %c0_i32_0 : i32, i32
  }
  func.func @transform_4(%arg0: i32) -> (i32, i32) {
    %c0_i32 = arith.constant 0 : i32
    %c0_i32_0 = arith.constant 0 : i32
    %c0_i32_1 = arith.constant 0 : i32
    return %c0_i32, %c0_i32_0 : i32, i32
  }
  func.func @transform_5(%arg0: i32) -> (i32, i32) {
    %c0_i32 = arith.constant 0 : i32
    %c0_i32_0 = arith.constant 0 : i32
    %c0_i32_1 = arith.constant 0 : i32
    return %c0_i32, %c0_i32_0 : i32, i32
  }
  func.func @transform_6(%arg0: i32) -> (i32, i32) {
    %c0_i32 = arith.constant 0 : i32
    %c0_i32_0 = arith.constant 0 : i32
    %c0_i32_1 = arith.constant 0 : i32
    return %c0_i32, %c0_i32_0 : i32, i32
  }
  func.func @transform_7(%arg0: i32) -> (i32, i32) {
    %c0_i32 = arith.constant 0 : i32
    %c0_i32_0 = arith.constant 0 : i32
    %c0_i32_1 = arith.constant 0 : i32
    return %c0_i32, %c0_i32_0 : i32, i32
  }
  func.func @transform_8(%arg0: i32) -> (i32, i32) {
    %c0_i32 = arith.constant 0 : i32
    %c0_i32_0 = arith.constant 0 : i32
    %c0_i32_1 = arith.constant 0 : i32
    return %c0_i32, %c0_i32_0 : i32, i32
  }
  func.func @transform_9(%arg0: i32) -> (i32, i32) {
    %c0_i32 = arith.constant 0 : i32
    %c0_i32_0 = arith.constant 0 : i32
    return %arg0, %c0_i32 : i32, i32
  }
}

</mosaic_0001>

<bundles_post_ra>
// kernel: autoencoder_forward.1
= control target key start
LH: loop header
LB: loop body
LE: loop exit
PB: predicated region body
PF: predicated region fallthrough
CT: control target
= control target key end

     0   :  { %14 = vsyncpa [#allocation3], 0  ;;  %s865_s0 = inlined_call_operand.vmem [shape: f32[8,128], index: 0, kind: input, shape index: {}]   ;;  %s866_s1 = inlined_call_operand.hbm [shape: bf16[65,128], index: 1, kind: input, shape index: {}]   ;;  %s867_s2 = inlined_call_operand.hbm [shape: bf16[33,128], index: 2, kind: input, shape index: {}]   ;;  %s868_s3 = inlined_call_operand.hbm [shape: bf16[17,128], index: 3, kind: input, shape index: {}]   ;;  %s869_s4 = inlined_call_operand.hbm [shape: bf16[17,128], index: 4, kind: input, shape index: {}]   ;;  %s870_s5 = inlined_call_operand.hbm [shape: bf16[17,128], index: 5, kind: input, shape index: {}]   ;;  %s871_s6 = inlined_call_operand.hbm [shape: bf16[17,128], index: 6, kind: input, shape index: {}]   ;;  %s872_s7 = inlined_call_operand.hbm [shape: bf16[17,128], index: 7, kind: input, shape index: {}]   ;;  %s873_s8 = inlined_call_operand.vmem [shape: bf16[33,128], index: 8, kind: input, shape index: {}]   ;;  %s874_s9 = inlined_call_operand.hbm [shape: f32[8,128], index: 9, kind: output, shape index: {}]  }
   0x1   :  { %15 = vsyncpa [#allocation6], 0 }
   0x2   :  { %16 = vsyncpa [#allocation9], 0 }
   0x3   :  { %17 = vsyncpa [#allocation12], 0 }
   0x4   :  { %18 = vsyncpa [#allocation4], 0  ;;  %s38_s11 = sshll.u32 %s867_s2, 4  ;;  %s741_s12 = smov [#allocation5]   ;;  %s39_s11 = int_to_ptr.hbm [resolvable:$true] %s38_s11 }
   0x5   :  { %s40_s13 = sshll.u32 %s741_s12, 4  ;;  %s64_s16 = sshll.u32 %s869_s4, 4  ;;  %s41_s13 = int_to_ptr.vmem [resolvable:$true] %s40_s13  ;;  %s65_s16 = int_to_ptr.hbm [resolvable:$true] %s64_s16 }
   0x6   :  { %s742_s17 = smov 64   ;;  %s743_s18 = smov 4  }
   0x7   :  { %46 = dma.hbm_to_vmem [thread:$0]  %s39_s11, 320, %s41_s13, [#allocation6], %s742_s17, %s742_s17, %s743_s18  }
   0x8   :  { %s744_s19 = smov [#allocation8]   ;;  %s90_s2 = sshll.u32 %s871_s6, 4  ;;  %s91_s2 = int_to_ptr.hbm [resolvable:$true] %s90_s2 }
   0x9   :  { %s66_s20 = sshll.u32 %s744_s19, 4  ;;  %s25_s24 = sshll.u32 %s866_s1, 4  ;;  %s67_s20 = int_to_ptr.vmem [resolvable:$true] %s66_s20  ;;  %s26_s24 = int_to_ptr.hbm [resolvable:$true] %s25_s24 }
   0xa   :  { %72 = dma.hbm_to_vmem [thread:$0]  %s65_s16, 192, %s67_s20, [#allocation9], %s742_s17, %s742_s17, %s743_s18  }
   0xb   :  { %s745_s25 = smov [#allocation11]   ;;  %s746_s27 = smov [#allocation2]  }
   0xc   :  { %s92_s26 = sshll.u32 %s745_s25, 4  ;;  %s27_s6 = sshll.u32 %s746_s27, 4  ;;  %s93_s26 = int_to_ptr.vmem [resolvable:$true] %s92_s26  ;;  %s28_s6 = int_to_ptr.vmem [resolvable:$true] %s27_s6 }
   0xd   :  { %98 = dma.hbm_to_vmem [thread:$0]  %s91_s2, 192, %s93_s26, [#allocation12], %s742_s17, %s742_s17, %s743_s18  }
   0xe   :  { %s51_s30 = sshll.u32 %s868_s3, 4  ;;  %s77_s11 = sshll.u32 %s870_s5, 4  ;;  %s52_s30 = int_to_ptr.hbm [resolvable:$true] %s51_s30  ;;  %s78_s11 = int_to_ptr.hbm [resolvable:$true] %s77_s11 }
   0xf   :  { %33 = dma.hbm_to_vmem [thread:$0]  %s26_s24, 576, %s28_s6, [#allocation3], %s742_s17, %s742_s17, %s743_s18  }
  0x10   :  { %s747_s12 = smov [#allocation7]   ;;  %s748_s14 = smov [#allocation10]  }
  0x11   :  { %s53_s13 = sshll.u32 %s747_s12, 4  ;;  %s79_s3 = sshll.u32 %s748_s14, 4  ;;  %s54_s13 = int_to_ptr.vmem [resolvable:$true] %s53_s13  ;;  %s80_s3 = int_to_ptr.vmem [resolvable:$true] %s79_s3 }
  0x12   :  { %59 = dma.hbm_to_vmem [thread:$0]  %s52_s30, 192, %s54_s13, [#allocation6], %s742_s17, %s742_s17, %s743_s18  }
  0x13   :  { %s103_s19 = sshll.u32 %s872_s7, 4  ;;  %s749_s5 = smov [#allocation13]   ;;  %s104_s19 = int_to_ptr.hbm [resolvable:$true] %s103_s19 }
  0x14   :  { %85 = dma.hbm_to_vmem [thread:$0]  %s78_s11, 192, %s80_s3, [#allocation9], %s742_s17, %s742_s17, %s743_s18  }
  0x15   :  { %s105_s20 = sshll.u32 %s749_s5, 4  ;;  %s106_s20 = int_to_ptr.vmem [resolvable:$true] %s105_s20 }
  0x16   :  { %111 = dma.hbm_to_vmem [thread:$0]  %s104_s19, 192, %s106_s20, [#allocation12], %s742_s17, %s742_s17, %s743_s18  }
  0x17   :  { %731 = dma.done.wait [#allocation3], 576  }
  0x18   :  { %732 = vsyncadd [#allocation3], 4294966720 }
  0x19   :  { %733 = dma.done.wait [#allocation6], 512  }
  0x1a   :  { %734 = vsyncadd [#allocation6], 4294966784 }
  0x1b   :  { %735 = dma.done.wait [#allocation9], 384  }
  0x1c   :  { %736 = vsyncadd [#allocation9], 4294966912 }
  0x1d   :  { %737 = dma.done.wait [#allocation12], 384  }
  0x1e   :  { %738 = vsyncadd [#allocation12], 4294966912  ;;  %v519_v0 = vld [vmem:[#allocation2 + $0x18] sm:$0xff]  ;;  %v518_v1 = vld [vmem:[#allocation2 + $0x10] sm:$0xff]  ;;  %vm180_vm0 = vcmask 523264   ;;  %vm220_vm2 = vcmask 261120  }
  0x1f   :  { %188 = vmatpush.bf16.msra.mxu0 %v519_v0  ;;  %v517_v2 = vld [vmem:[#allocation2 + $0x8] sm:$0xff]  ;;  %v516_v3 = vld [vmem:[#allocation2] sm:$0xff]  ;;  %v522_v17 = vld [vmem:[#allocation7] sm:$0xff]  ;;  %vm252_vm4 = vcmask 130048   ;;  %s750_s23 = smov [#allocation14]   ;;  %s443_s27 = sshll.u32 %s874_s9, 4  ;;  %s444_s27 = int_to_ptr.hbm [resolvable:$true] %s443_s27 }
  0x20   :  { %v143_v4 = vld [vmem:[%s865_s0] sm:$0xff]  ;;  %v521_v6 = vld [vmem:[#allocation5 + $0x8] sm:$0xff]  ;;  %263 = vmatpush.bf16.msra.mxu2 %v522_v17  ;;  %v204_v18 = vld [vmem:[#allocation5 + $0x10] sm:$0x1]  ;;  %s441_s24 = sshll.u32 %s750_s23, 4  ;;  %s442_s24 = int_to_ptr.vmem [resolvable:$true] %s441_s24 }
  0x21   :  { %v154_v5 = vpack.c.bf16 %v143_v4, %v143_v4  ;;  %230 = vmatpush.bf16.msra.mxu1 %v521_v6  ;;  %v520_v7 = vld [vmem:[#allocation5] sm:$0xff]  ;;  %v152_v8 = vld [vmem:[#allocation2 + $0x20] sm:$0x1]  ;;  %v205_v19 = vunpack.c.l.bf16 %v204_v18  ;;  %v524_v28 = vld [vmem:[#allocation10] sm:$0xff] }
  0x22   :  { %v153_v9 = vunpack.c.l.bf16 %v152_v8  ;;  %v523_v27 = vld [vmem:[#allocation8] sm:$0xff]  ;;  %v242_v29 = vld [vmem:[#allocation7 + $0x8] sm:$0x1]  ;;  %v274_v39 = vld [vmem:[#allocation8 + $0x8] sm:$0x1] }
  0x23   :  { %189 = vmatpush.bf16.msra.mxu0 %v518_v1  ;;  %v207_v20 = vperm.slane %v205_v19, 0  ;;  %294 = vmatpush.bf16.msra.mxu3 %v523_v27  ;;  %v243_v30 = vunpack.c.l.bf16 %v242_v29  ;;  %v525_v38 = vld [vmem:[#allocation11] sm:$0xff]  ;;  %v275_v40 = vunpack.c.l.bf16 %v274_v39  ;;  %v526_v48 = vld [vmem:[#allocation13] sm:$0xff]  ;;  %v305_v49 = vld [vmem:[#allocation10 + $0x8] sm:$0x1] }
  0x24   :  { %v155_v10 = vperm.slane %v153_v9, 0  ;;  %325 = vmatpush.bf16.msrb.mxu2 %v524_v28  ;;  %v306_v50 = vunpack.c.l.bf16 %v305_v49  ;;  %v528_v58 = vld [vmem:[%s873_s8 + $0x8] sm:$0xff]  ;;  %v336_v59 = vld [vmem:[#allocation11 + $0x8] sm:$0x1] }
  0x25   :  { %231 = vmatpush.bf16.msra.mxu1 %v520_v7  ;;  %v245_v31 = vperm.slane %v243_v30, 0  ;;  %v277_v41 = vperm.slane %v275_v40, 0  ;;  %v337_v60 = vunpack.c.l.bf16 %v336_v59  ;;  %v527_v4 = vld [vmem:[%s873_s8] sm:$0xff] }
  0x26   :  { %v308_v51 = vperm.slane %v306_v50, 0 }
  0x27   :  { %190 = vmatpush.bf16.msra.mxu0 %v517_v2  ;;  %356 = vmatpush.bf16.msrb.mxu3 %v525_v38  ;;  %v339_v61 = vperm.slane %v337_v60, 0 }
  0x29   :  { %387 = vmatpush.bf16.msrb.mxu1 %v526_v48 }
  0x2b   :  { %191 = vmatpush.bf16.msra.mxu0 %v516_v3 }
  0x2e   :  { %472 = vmatmul.msk.bf16.vlgmr.msra.gmra.mxu0 %vm180_vm0, %v154_v5  ;;  %v367_v5 = vld [vmem:[#allocation13 + $0x8] sm:$0x1] }
  0x2f   :  { %425 = vmatpush.bf16.msrb.mxu0 %v528_v58  ;;  %v368_v6 = vunpack.c.l.bf16 %v367_v5 }
  0x31   :  { %v370_v7 = vperm.slane %v368_v6, 0 }
  0x33   :  { %426 = vmatpush.bf16.msrb.mxu0 %v527_v4 }
  0xab   :  { %v193_v11 = vpop.f32.mrf.mxu0 }
  0xac   :  { %v194_v12 = vadd.f32 %v193_v11, %v155_v10 }
  0xae   :  { %vm197_vm1 = vcmp.gt.f32.partialorder %v194_v12, 0.0  ;;  %v198_v13 = vmul.f32 0.01, %v194_v12 }
  0xb0   :  { %v199_v14 = vsel %vm197_vm1, %v194_v12, %v198_v13 }
  0xb1   :  { %v206_v15 = vpack.c.bf16 %v199_v14, %v199_v14  ;;  %v400_v14 = vld [vmem:[%s873_s8 + $0x10] sm:$0x1] }
  0xb3   :  { %v195_v16 = vpop.f32.mrf.mxu0  ;;  %481 = vmatmul.msk.bf16.vlgmr.msra.gmra.mxu1 %vm220_vm2, %v206_v15  ;;  %v401_v15 = vunpack.c.l.bf16 %v400_v14 }
  0xb5   :  { %v403_v16 = vperm.slane %v401_v15, 0 }
 0x130   :  { %v233_v21 = vpop.f32.mrf.mxu1 }
 0x131   :  { %v234_v22 = vadd.f32 %v233_v21, %v207_v20 }
 0x133   :  { %vm237_vm3 = vcmp.gt.f32.partialorder %v234_v22, 0.0  ;;  %v238_v23 = vmul.f32 0.01, %v234_v22 }
 0x135   :  { %v239_v24 = vsel %vm237_vm3, %v234_v22, %v238_v23 }
 0x136   :  { %v244_v25 = vpack.c.bf16 %v239_v24, %v239_v24 }
 0x138   :  { %v235_v26 = vpop.f32.mrf.mxu1  ;;  %486 = vmatmul.msk.bf16.vlgmr.msra.gmra.mxu2 %vm252_vm4, %v244_v25 }
 0x1bb   :  { %v265_v32 = vpop.f32.mrf.mxu2 }
 0x1bc   :  { %v266_v33 = vadd.f32 %v265_v32, %v245_v31 }
 0x1be   :  { %vm269_vm5 = vcmp.gt.f32.partialorder %v266_v33, 0.0  ;;  %v270_v34 = vmul.f32 0.01, %v266_v33 }
 0x1c0   :  { %v271_v35 = vsel %vm269_vm5, %v266_v33, %v270_v34 }
 0x1c1   :  { %v276_v36 = vpack.c.bf16 %v271_v35, %v271_v35 }
 0x1c3   :  { %v267_v37 = vpop.f32.mrf.mxu2  ;;  %491 = vmatmul.msk.bf16.vlgmr.msra.gmra.mxu3 %vm252_vm4, %v276_v36 }
 0x246   :  { %v296_v42 = vpop.f32.mrf.mxu3 }
 0x247   :  { %v297_v43 = vadd.f32 %v296_v42, %v277_v41 }
 0x249   :  { %vm300_vm6 = vcmp.gt.f32.partialorder %v297_v43, 0.0  ;;  %v301_v44 = vmul.f32 0.01, %v297_v43 }
 0x24b   :  { %v302_v45 = vsel %vm300_vm6, %v297_v43, %v301_v44 }
 0x24c   :  { %v307_v46 = vpack.c.bf16 %v302_v45, %v302_v45 }
 0x24e   :  { %v298_v47 = vpop.f32.mrf.mxu3  ;;  %496 = vmatmul.msk.bf16.vlgmr.msrb.gmra.mxu2 %vm252_vm4, %v307_v46 }
 0x2d1   :  { %v327_v52 = vpop.f32.mrf.mxu2 }
 0x2d2   :  { %v328_v53 = vadd.f32 %v327_v52, %v308_v51 }
 0x2d4   :  { %vm331_vm7 = vcmp.gt.f32.partialorder %v328_v53, 0.0  ;;  %v332_v54 = vmul.f32 0.01, %v328_v53 }
 0x2d6   :  { %v333_v55 = vsel %vm331_vm7, %v328_v53, %v332_v54 }
 0x2d7   :  { %v338_v56 = vpack.c.bf16 %v333_v55, %v333_v55 }
 0x2d9   :  { %v329_v57 = vpop.f32.mrf.mxu2  ;;  %501 = vmatmul.msk.bf16.vlgmr.msrb.gmra.mxu3 %vm252_vm4, %v338_v56 }
 0x35c   :  { %v358_v62 = vpop.f32.mrf.mxu3 }
 0x35d   :  { %v359_v63 = vadd.f32 %v358_v62, %v339_v61 }
 0x35f   :  { %vm362_vm8 = vcmp.gt.f32.partialorder %v359_v63, 0.0  ;;  %v363_v0 = vmul.f32 0.01, %v359_v63 }
 0x361   :  { %v364_v1 = vsel %vm362_vm8, %v359_v63, %v363_v0 }
 0x362   :  { %v369_v2 = vpack.c.bf16 %v364_v1, %v364_v1 }
 0x364   :  { %v360_v3 = vpop.f32.mrf.mxu3  ;;  %506 = vmatmul.msk.bf16.vlgmr.msrb.gmra.mxu1 %vm252_vm4, %v369_v2 }
 0x3e1   :  { %v389_v8 = vpop.f32.mrf.mxu1 }
 0x3e2   :  { %v390_v9 = vadd.f32 %v389_v8, %v370_v7 }
 0x3e4   :  { %vm393_vm9 = vcmp.gt.f32.partialorder %v390_v9, 0.0  ;;  %v394_v10 = vmul.f32 0.01, %v390_v9 }
 0x3e6   :  { %v395_v11 = vsel %vm393_vm9, %v390_v9, %v394_v10 }
 0x3e7   :  { %v402_v12 = vpack.c.bf16 %v395_v11, %v395_v11 }
 0x3e9   :  { %v391_v13 = vpop.f32.mrf.mxu1  ;;  %515 = vmatmul.msk.bf16.vlgmr.msrb.gmra.mxu0 %vm220_vm2, %v402_v12 }
 0x466   :  { %v428_v17 = vpop.f32.mrf.mxu0 }
 0x467   :  { %v429_v18 = vadd.f32 %v428_v17, %v403_v16 }
 0x469   :  { %vm432_vm10 = vcmp.gt.f32.partialorder %v429_v18, 0.0  ;;  %v433_v19 = vmul.f32 0.01, %v429_v18 }
 0x46b   :  { %v434_v20 = vsel %vm432_vm10, %v429_v18, %v433_v19 }
 0x46c   :  { %435 = vst [vmem:[#allocation14] sm:$0xff] %v434_v20 }
 0x46d   :  { %446 = dma.vmem_to_hbm [thread:$0]  %s442_s24, 128, %s444_s27, [#allocation4]  }
 0x46e   :  { %v430_v21 = vpop.f32.mrf.mxu0 }
 0x46f   :  { %739 = dma.done.wait [#allocation4], 128  }
 0x470   :  { %740 = vsyncadd [#allocation4], 4294967168 }
 0x471   :  { %451 = vsyncpa [#allocation3], 1 }
 0x472   :  { %452 = vsyncpa [#allocation6], 1 }
 0x473   :  { %453 = vsyncpa [#allocation9], 1 }
 0x474   :  { %454 = vsyncpa [#allocation12], 1 }
 0x475   :  { %455 = vsyncpa [#allocation4], 1 }

</bundles_post_ra>
